<compile_context>
chip_gen: v7x
topology: tpu7x:2x2x1
jax: 0.10.0
libtpu: 0.0.40
codegen_flags: <defaults>
</compile_context>

<pallas_src>
import math

import jax
import jax.numpy as jnp
from jax import lax
from jax.experimental import pallas as pl
from jax.experimental.pallas import tpu as pltpu


# ----------------------------------------------------------------------------
# Kernel: whole sequence in one grid step, time loop inside the body.
# ----------------------------------------------------------------------------
def _gru_seq_kernel(x_ref,                   # (T, B, H) pre-gathered embeddings
                    h0_ref,                  # (B, H)    initial hidden
                    wih_ref, whh_ref,        # (H, 3H)   fused GRU weights, gate order r|z|n
                    bih_ref, bhh_ref,        # (1, 3H)   packed biases
                    out_ref):                # (T, B, H) hidden state at every step
    T = x_ref.shape[0]
    B = h0_ref.shape[0]
    H = h0_ref.shape[-1]

    # Load weights once; they stay resident across all time steps.
    wih = wih_ref[...]                       # (H, 3H)
    whh = whh_ref[...]                       # (H, 3H)
    # Hoist the bias broadcasts out of the loop (JAX does not CSE broadcast_in_dim).
    bih = jnp.broadcast_to(bih_ref[...], (B, 3 * H))
    bhh = jnp.broadcast_to(bhh_ref[...], (B, 3 * H))

    def step(t, h):                          # h: (B, H)
        x = x_ref[t]                         # (B, H) embedding row(s) for step t
        # Two fused MXU dots instead of six per-gate matmuls.
        gi = jnp.dot(x, wih, preferred_element_type=jnp.float32) + bih
        gh = jnp.dot(h, whh, preferred_element_type=jnp.float32) + bhh
        r = jax.nn.sigmoid(gi[:, :H] + gh[:, :H])
        z = jax.nn.sigmoid(gi[:, H:2 * H] + gh[:, H:2 * H])
        n = jnp.tanh(gi[:, 2 * H:] + r * gh[:, 2 * H:])   # b_hn correctly inside r*(...)
        h_new = (1.0 - z) * n + z * h
        out_ref[t] = h_new                   # store into the resident output block
        return h_new

    # Short fixed trip counts: unroll for LLO scheduler visibility.
    lax.fori_loop(0, T, step, h0_ref[...], unroll=T <= 16)


# ----------------------------------------------------------------------------
# pallas_call wrapper: single launch, everything resident in VMEM.
# ----------------------------------------------------------------------------
def _run_gru(prepped, emb_seq, h0):
    """emb_seq: (T, B, H) f32, h0: (B, H) f32 -> hidden states (T, B, H) f32."""
    T, B, H = emb_seq.shape

    grid_spec = pltpu.PrefetchScalarGridSpec(
        num_scalar_prefetch=0,
        grid=(1,),
        in_specs=[
            pl.BlockSpec((T, B, H), lambda i: (0, 0, 0)),      # embeddings (resident)
            pl.BlockSpec((B, H), lambda i: (0, 0)),            # h0
            pl.BlockSpec((H, 3 * H), lambda i: (0, 0)),        # W_ih^T
            pl.BlockSpec((H, 3 * H), lambda i: (0, 0)),        # W_hh^T
            pl.BlockSpec((1, 3 * H), lambda i: (0, 0)),        # b_ih
            pl.BlockSpec((1, 3 * H), lambda i: (0, 0)),        # b_hh
        ],
        out_specs=pl.BlockSpec((T, B, H), lambda i: (0, 0, 0)),  # resident output
    )

    return pl.pallas_call(
        _gru_seq_kernel,
        out_shape=jax.ShapeDtypeStruct((T, B, H), jnp.float32),
        grid_spec=grid_spec,
        compiler_params=pltpu.CompilerParams(
            dimension_semantics=("arbitrary",)),
    )(emb_seq, h0,
      prepped["w_ih_t"], prepped["w_hh_t"], prepped["b_ih"], prepped["b_hh"])


# ----------------------------------------------------------------------------
# Public API mirroring the nn.Module
# ----------------------------------------------------------------------------
def encoder_rnn_forward(prepped, input_token, hidden):
    """Exact EncoderRNN.forward semantics: one token (batch=1) + previous hidden.

    Returns (output [1,1,H], hidden [1,1,H]); for a 1-layer GRU they are equal.
    """
    H = prepped["w_ih_t"].shape[0]
    tok = jnp.asarray(input_token, jnp.int32).reshape((1,))
    emb = prepped["emb"][tok].reshape(1, 1, H)                 # pre-gathered (T=1,B=1,H)
    h0 = hidden.reshape(1, H).astype(jnp.float32)
    outs = _run_gru(prepped, emb, h0)                          # (1, 1, H)
    out = outs.reshape(1, 1, H)
    return out, out


def encoder_rnn_encode_sequence(prepped, tokens, hidden):
    """Whole token sequence (batch=1) encoded in ONE pallas_call."""
    H = prepped["w_ih_t"].shape[0]
    tokens = jnp.asarray(tokens, jnp.int32).reshape(-1)
    T = tokens.shape[0]
    emb = prepped["emb"][tokens].reshape(T, 1, H)              # one bulk gather
    h0 = hidden.reshape(1, H).astype(jnp.float32)
    outs = _run_gru(prepped, emb, h0)                          # (T, 1, H)
    return outs, outs[-1].reshape(1, 1, H)


def encoder_rnn_encode_batch(prepped, tokens_tb, hidden_b):
    """B independent sequences packed into the sublane/M dim: tokens (T, B)."""
    H = prepped["w_ih_t"].shape[0]
    tokens_tb = jnp.asarray(tokens_tb, jnp.int32)
    T, B = tokens_tb.shape
    emb = prepped["emb"][tokens_tb.reshape(-1)].reshape(T, B, H)
    h0 = hidden_b.reshape(B, H).astype(jnp.float32)
    outs = _run_gru(prepped, emb, h0)                          # (T, B, H)
    return outs, outs[-1]


# ----------------------------------------------------------------------------
# One-time parameter prep (hoisted out of the per-step path)
# ----------------------------------------------------------------------------
def prep_params(raw):
    """Transpose PyTorch-layout GRU weights so the kernel computes x @ W and
    pack the biases into (1, 3H) rows (gate order r | z | n). Done once."""
    H = raw["emb"].shape[1]
    return {
        "emb": raw["emb"].astype(jnp.float32),                   # (V, H)
        "w_ih_t": raw["w_ih"].T.astype(jnp.float32),              # (H, 3H)
        "w_hh_t": raw["w_hh"].T.astype(jnp.float32),              # (H, 3H)
        "b_ih": raw["b_ih"].reshape(1, 3 * H).astype(jnp.float32),
        "b_hh": raw["b_hh"].reshape(1, 3 * H).astype(jnp.float32),
    }


def init_raw_params(key, input_size, hidden_size):
    """Deterministic synthetic parameters mirroring the nn.Module shapes."""
    H, V = hidden_size, input_size
    ks = jax.random.split(key, 5)
    bound = 1.0 / math.sqrt(H)
    uni = lambda k, shape: jax.random.uniform(k, shape, jnp.float32, -bound, bound)
    return {
        "emb": jax.random.normal(ks[0], (V, H), jnp.float32),    # nn.Embedding
        "w_ih": uni(ks[1], (3 * H, H)),                          # GRU weight_ih_l0
        "w_hh": uni(ks[2], (3 * H, H)),                          # GRU weight_hh_l0
        "b_ih": uni(ks[3], (3 * H,)),                            # GRU bias_ih_l0
        "b_hh": uni(ks[4], (3 * H,)),                            # GRU bias_hh_l0
    }


# ----------------------------------------------------------------------------
# Pure-JAX reference (highest-precision dots so the reference itself is exact)
# ----------------------------------------------------------------------------
def _gru_cell_ref(raw, x, h):
    H = h.shape[-1]
    hp = lax.Precision.HIGHEST
    gi = jnp.dot(x, raw["w_ih"].T, precision=hp) + raw["b_ih"]
    gh = jnp.dot(h, raw["w_hh"].T, precision=hp) + raw["b_hh"]
    i_r, i_z, i_n = gi[:, :H], gi[:, H:2 * H], gi[:, 2 * H:]
    h_r, h_z, h_n = gh[:, :H], gh[:, H:2 * H], gh[:, 2 * H:]
    r = jax.nn.sigmoid(i_r + h_r)
    z = jax.nn.sigmoid(i_z + h_z)
    n = jnp.tanh(i_n + r * h_n)
    return (1.0 - z) * n + z * h


def reference_forward(raw, token, hidden):
    H = raw["emb"].shape[1]
    emb = raw["emb"][token].reshape(1, -1)
    h_new = _gru_cell_ref(raw, emb, hidden.reshape(1, H))
    return h_new.reshape(1, 1, H), h_new.reshape(1, 1, H)


if __name__ == "__main__":
    VOCAB, HIDDEN, SEQ, BATCH = 256, 128, 8, 8   # H=128 keeps gate slices lane-aligned

    key = jax.random.PRNGKey(0)
    k_par, k_tok, k_hid, k_btok, k_bhid = jax.random.split(key, 5)

    raw = init_raw_params(k_par, VOCAB, HIDDEN)
    prepped = prep_params(raw)

    # Tolerance: tighter than before, but loose enough for MXU multi-pass f32 matmul.
    TOL = dict(atol=1e-2, rtol=1e-2)

    # --- single step: exact EncoderRNN.forward semantics -------------------
    token = jax.random.randint(k_tok, (1,), 0, VOCAB, dtype=jnp.int32)       # [batch=1]
    hidden = jax.random.normal(k_hid, (1, 1, HIDDEN), dtype=jnp.float32)     # (n_layers, 1, H)

    out, new_hidden = encoder_rnn_forward(prepped, token, hidden)
    jax.block_until_ready((out, new_hidden))

    ref_out, ref_hid = reference_forward(raw, token[0], hidden)
    assert out.shape == (1, 1, HIDDEN)
    assert new_hidden.shape == (1, 1, HIDDEN)
    assert jnp.allclose(out, ref_out, **TOL)
    assert jnp.allclose(new_hidden, ref_hid, **TOL)

    # --- fused multi-step encoder (whole sequence in one pallas_call) ------
    tokens = jax.random.randint(k_tok, (SEQ,), 0, VOCAB, dtype=jnp.int32)
    outs, h_last = encoder_rnn_encode_sequence(prepped, tokens, hidden)
    jax.block_until_ready((outs, h_last))

    h_ref = hidden.reshape(1, HIDDEN)
    ref_seq = []
    for t in range(SEQ):
        x = raw["emb"][tokens[t]].reshape(1, -1)
        h_ref = _gru_cell_ref(raw, x, h_ref)
        ref_seq.append(h_ref)
    ref_seq = jnp.stack(ref_seq).reshape(SEQ, 1, HIDDEN)
    assert outs.shape == (SEQ, 1, HIDDEN)
    assert h_last.shape == (1, 1, HIDDEN)
    assert jnp.allclose(outs, ref_seq, **TOL)
    assert jnp.allclose(h_last, ref_seq[-1].reshape(1, 1, HIDDEN), **TOL)

    # --- batched sequences: fill MXU rows / vreg sublanes ------------------
    btokens = jax.random.randint(k_btok, (SEQ, BATCH), 0, VOCAB, dtype=jnp.int32)
    bhidden = jax.random.normal(k_bhid, (BATCH, HIDDEN), dtype=jnp.float32)
    bouts, bh_last = encoder_rnn_encode_batch(prepped, btokens, bhidden)
    jax.block_until_ready((bouts, bh_last))

    h_ref = bhidden
    bref = []
    for t in range(SEQ):
        x = raw["emb"][btokens[t]]
        h_ref = _gru_cell_ref(raw, x, h_ref)
        bref.append(h_ref)
    bref = jnp.stack(bref)
    assert bouts.shape == (SEQ, BATCH, HIDDEN)
    assert bh_last.shape == (BATCH, HIDDEN)
    assert jnp.allclose(bouts, bref, **TOL)
    assert jnp.allclose(bh_last, bref[-1], **TOL)

    print("KERNEL_OK")
</pallas_src>

<mosaic_0001>
module attributes {stable_mosaic.version = 11 : i64} {
  func.func @_gru_seq_kernel(%arg0: i32, %arg1: memref<1x1x128xf32, #tpu.memory_space<vmem>>, %arg2: memref<1x128xf32, #tpu.memory_space<vmem>>, %arg3: memref<128x384xf32, #tpu.memory_space<vmem>>, %arg4: memref<128x384xf32, #tpu.memory_space<vmem>>, %arg5: memref<1x384xf32, #tpu.memory_space<vmem>>, %arg6: memref<1x384xf32, #tpu.memory_space<vmem>>, %arg7: memref<1x1x128xf32, #tpu.memory_space<vmem>>) attributes {dimension_semantics = [#tpu.dimension_semantics<arbitrary>], iteration_bounds = array<i64: 1>, scalar_prefetch = 0 : i64, scratch_operands = 0 : i64, tpu.core_type = #tpu.core_type<tc>, window_params = [{pipeline_mode = #tpu.pipeline_mode<synchronous>, transform_indices = @transform_0, window_bounds = array<i64: 1, 1, 128>}, {pipeline_mode = #tpu.pipeline_mode<synchronous>, transform_indices = @transform_1, window_bounds = array<i64: 1, 128>}, {pipeline_mode = #tpu.pipeline_mode<synchronous>, transform_indices = @transform_2, window_bounds = array<i64: 128, 384>}, {pipeline_mode = #tpu.pipeline_mode<synchronous>, transform_indices = @transform_3, window_bounds = array<i64: 128, 384>}, {pipeline_mode = #tpu.pipeline_mode<synchronous>, transform_indices = @transform_4, window_bounds = array<i64: 1, 384>}, {pipeline_mode = #tpu.pipeline_mode<synchronous>, transform_indices = @transform_5, window_bounds = array<i64: 1, 384>}, {pipeline_mode = #tpu.pipeline_mode<synchronous>, transform_indices = @transform_6, window_bounds = array<i64: 1, 1, 128>}]} {
    %c0 = arith.constant 0 : index
    %c0_0 = arith.constant 0 : index
    %0 = vector.load %arg3[%c0, %c0_0] : memref<128x384xf32, #tpu.memory_space<vmem>>, vector<128x384xf32>
    %c0_1 = arith.constant 0 : index
    %c0_2 = arith.constant 0 : index
    %1 = vector.load %arg4[%c0_1, %c0_2] : memref<128x384xf32, #tpu.memory_space<vmem>>, vector<128x384xf32>
    %c0_3 = arith.constant 0 : index
    %c0_4 = arith.constant 0 : index
    %2 = vector.load %arg5[%c0_3, %c0_4] : memref<1x384xf32, #tpu.memory_space<vmem>>, vector<1x384xf32>
    %c0_5 = arith.constant 0 : index
    %c0_6 = arith.constant 0 : index
    %3 = vector.load %arg6[%c0_5, %c0_6] : memref<1x384xf32, #tpu.memory_space<vmem>>, vector<1x384xf32>
    %c0_7 = arith.constant 0 : index
    %c0_8 = arith.constant 0 : index
    %4 = vector.load %arg2[%c0_7, %c0_8] : memref<1x128xf32, #tpu.memory_space<vmem>>, vector<1x128xf32>
    %c0_i32 = arith.constant 0 : i32
    %5 = arith.index_cast %c0_i32 : i32 to index
    %c0_9 = arith.constant 0 : index
    %c0_10 = arith.constant 0 : index
    %6 = vector.load %arg1[%5, %c0_9, %c0_10] : memref<1x1x128xf32, #tpu.memory_space<vmem>>, vector<1x1x128xf32>
    %7 = vector.shape_cast %6 : vector<1x1x128xf32> to vector<1x128xf32>
    %cst = arith.constant dense<0.000000e+00> : vector<1x384xf32>
    %8 = tpu.matmul %7, %0, %cst {dimension_numbers = #tpu.dot_dimension_numbers<[1], [0], [0], [1], [0, 0, 1, 1], [], []>} : vector<1x128xf32>, vector<128x384xf32>, vector<1x384xf32> -> vector<1x384xf32>
    %9 = arith.addf %8, %2 : vector<1x384xf32>
    %cst_11 = arith.constant dense<0.000000e+00> : vector<1x384xf32>
    %10 = tpu.matmul %4, %1, %cst_11 {dimension_numbers = #tpu.dot_dimension_numbers<[1], [0], [0], [1], [0, 0, 1, 1], [], []>} : vector<1x128xf32>, vector<128x384xf32>, vector<1x384xf32> -> vector<1x384xf32>
    %11 = arith.addf %10, %3 : vector<1x384xf32>
    %12 = vector.extract_strided_slice %9 {offsets = [0, 0], sizes = [1, 128], strides = [1, 1]} : vector<1x384xf32> to vector<1x128xf32>
    %13 = vector.extract_strided_slice %11 {offsets = [0, 0], sizes = [1, 128], strides = [1, 1]} : vector<1x384xf32> to vector<1x128xf32>
    %14 = arith.addf %12, %13 : vector<1x128xf32>
    %15 = arith.negf %14 : vector<1x128xf32>
    %16 = math.exp %15 : vector<1x128xf32>
    %cst_12 = arith.constant 1.000000e+00 : f32
    %17 = vector.broadcast %cst_12 : f32 to vector<1x128xf32>
    %18 = arith.addf %17, %16 : vector<1x128xf32>
    %19 = arith.divf %17, %18 : vector<1x128xf32>
    %20 = vector.extract_strided_slice %9 {offsets = [0, 128], sizes = [1, 128], strides = [1, 1]} : vector<1x384xf32> to vector<1x128xf32>
    %21 = vector.extract_strided_slice %11 {offsets = [0, 128], sizes = [1, 128], strides = [1, 1]} : vector<1x384xf32> to vector<1x128xf32>
    %22 = arith.addf %20, %21 : vector<1x128xf32>
    %23 = arith.negf %22 : vector<1x128xf32>
    %24 = math.exp %23 : vector<1x128xf32>
    %cst_13 = arith.constant 1.000000e+00 : f32
    %25 = vector.broadcast %cst_13 : f32 to vector<1x128xf32>
    %26 = arith.addf %25, %24 : vector<1x128xf32>
    %27 = arith.divf %25, %26 : vector<1x128xf32>
    %28 = vector.extract_strided_slice %9 {offsets = [0, 256], sizes = [1, 128], strides = [1, 1]} : vector<1x384xf32> to vector<1x128xf32>
    %29 = vector.extract_strided_slice %11 {offsets = [0, 256], sizes = [1, 128], strides = [1, 1]} : vector<1x384xf32> to vector<1x128xf32>
    %30 = arith.mulf %19, %29 : vector<1x128xf32>
    %31 = arith.addf %28, %30 : vector<1x128xf32>
    %32 = math.tanh %31 : vector<1x128xf32>
    %cst_14 = arith.constant 1.000000e+00 : f32
    %33 = vector.broadcast %cst_14 : f32 to vector<1x128xf32>
    %34 = arith.subf %33, %27 : vector<1x128xf32>
    %35 = arith.mulf %34, %32 : vector<1x128xf32>
    %36 = arith.mulf %27, %4 : vector<1x128xf32>
    %37 = arith.addf %35, %36 : vector<1x128xf32>
    %38 = arith.index_cast %c0_i32 : i32 to index
    %c0_15 = arith.constant 0 : index
    %c0_16 = arith.constant 0 : index
    %39 = vector.load %arg7[%38, %c0_15, %c0_16] : memref<1x1x128xf32, #tpu.memory_space<vmem>>, vector<1x1x128xf32>
    %40 = vector.shape_cast %39 : vector<1x1x128xf32> to vector<1x128xf32>
    %41 = vector.shape_cast %37 : vector<1x128xf32> to vector<1x1x128xf32>
    tpu.vector_store %arg7[%38, %c0_15, %c0_16], %41 {strides = array<i32>} : memref<1x1x128xf32, #tpu.memory_space<vmem>>, vector<1x1x128xf32>,
    %c1_i32 = arith.constant 1 : i32
    return
  }
  func.func @transform_0(%arg0: i32) -> (i32, i32, i32) {
    %c0_i32 = arith.constant 0 : i32
    %c0_i32_0 = arith.constant 0 : i32
    %c0_i32_1 = arith.constant 0 : i32
    %c0_i32_2 = arith.constant 0 : i32
    return %c0_i32, %c0_i32_0, %c0_i32_1 : i32, i32, i32
  }
  func.func @transform_1(%arg0: i32) -> (i32, i32) {
    %c0_i32 = arith.constant 0 : i32
    %c0_i32_0 = arith.constant 0 : i32
    %c0_i32_1 = arith.constant 0 : i32
    return %c0_i32, %c0_i32_0 : i32, i32
  }
  func.func @transform_2(%arg0: i32) -> (i32, i32) {
    %c0_i32 = arith.constant 0 : i32
    %c0_i32_0 = arith.constant 0 : i32
    %c0_i32_1 = arith.constant 0 : i32
    return %c0_i32, %c0_i32_0 : i32, i32
  }
  func.func @transform_3(%arg0: i32) -> (i32, i32) {
    %c0_i32 = arith.constant 0 : i32
    %c0_i32_0 = arith.constant 0 : i32
    %c0_i32_1 = arith.constant 0 : i32
    return %c0_i32, %c0_i32_0 : i32, i32
  }
  func.func @transform_4(%arg0: i32) -> (i32, i32) {
    %c0_i32 = arith.constant 0 : i32
    %c0_i32_0 = arith.constant 0 : i32
    %c0_i32_1 = arith.constant 0 : i32
    return %c0_i32, %c0_i32_0 : i32, i32
  }
  func.func @transform_5(%arg0: i32) -> (i32, i32) {
    %c0_i32 = arith.constant 0 : i32
    %c0_i32_0 = arith.constant 0 : i32
    %c0_i32_1 = arith.constant 0 : i32
    return %c0_i32, %c0_i32_0 : i32, i32
  }
  func.func @transform_6(%arg0: i32) -> (i32, i32, i32) {
    %c0_i32 = arith.constant 0 : i32
    %c0_i32_0 = arith.constant 0 : i32
    %c0_i32_1 = arith.constant 0 : i32
    %c0_i32_2 = arith.constant 0 : i32
    return %c0_i32, %c0_i32_0, %c0_i32_1 : i32, i32, i32
  }
}

</mosaic_0001>

<bundles_post_ra>
// kernel: tpu_custom_call.1
= control target key start
LH: loop header
LB: loop body
LE: loop exit
PB: predicated region body
PF: predicated region fallthrough
CT: control target
= control target key end

     0   :  { %11 = vsyncpa [#allocation3], 0  ;;  %s981_s0 = inlined_call_operand.hbm [shape: f32[1,1,128], index: 0, kind: input, shape index: {}]   ;;  %s982_s1 = inlined_call_operand.vmem [shape: f32[1,128], index: 1, kind: input, shape index: {}]   ;;  %s983_s2 = inlined_call_operand.hbm [shape: f32[128,384], index: 2, kind: input, shape index: {}]   ;;  %s984_s3 = inlined_call_operand.hbm [shape: f32[128,384], index: 3, kind: input, shape index: {}]   ;;  %s985_s4 = inlined_call_operand.vmem [shape: f32[1,384], index: 4, kind: input, shape index: {}]   ;;  %s986_s5 = inlined_call_operand.vmem [shape: f32[1,384], index: 5, kind: input, shape index: {}]   ;;  %s987_s6 = inlined_call_operand.hbm [shape: f32[1,1,128], index: 6, kind: output, shape index: {}]  }
   0x1   :  { %12 = vsyncpa [#allocation6], 0 }
   0x2   :  { %13 = vsyncpa [#allocation4], 0  ;;  %s852_s21 = smov [#allocation5]   ;;  %s758_s25 = scalar_lea.hbm %s983_s2, 6144 }
   0x3   :  { %s31_s22 = sshll.u32 %s852_s21, 4  ;;  %p759_p0 = scmp.ne.s32.totalorder %s983_s2, %s758_s25  ;;  %s32_s22 = int_to_ptr.vmem [resolvable:$true] %s31_s22 }
   0x4   :  { %p762_p1 = scmp.lt.u32.totalorder %s758_s25, %s983_s2 }
   0x6   :  { %p764_p2 = pnand %p762_p1, %p759_p0 }
   0x8   :  { %767 = shalt.err (!%p764_p2)
}
   0x9   :  { %s768_s30 = scalar_lea.vmem %s32_s22, 6144  ;;  %p773_p4 = scmp.lt.s32.totalorder %s32_s22, %s32_s22 }
   0xa   :  { %p769_p3 = scmp.ne.s32.totalorder %s32_s22, %s768_s30  ;;  %p774_p5 = scmp.lt.s32.totalorder %s768_s30, %s768_s30 }
   0xc   :  { %p775_p6 = por %p774_p5, %p773_p4 }
   0xe   :  { %p776_p7 = pnand %p775_p6, %p769_p3 }
  0x10   :  { %779 = shalt.err (!%p776_p7)
}
  0x11   :  { %s853_s7 = smov 384   ;;  %s854_s8 = smov 24  }
  0x12   :  { %37 = dma.hbm_to_vmem [thread:$0]  %s983_s2, 6144, %s32_s22, [#allocation6], %s853_s7, %s853_s7, %s854_s8  }
  0x13   :  { %s855_s11 = smov [#allocation2]   ;;  %s856_s13 = smov [#allocation7]  }
  0x14   :  { %s20_s12 = sshll.u32 %s855_s11, 4  ;;  %s43_s14 = sshll.u32 %s856_s13, 4  ;;  %s21_s12 = int_to_ptr.vmem [resolvable:$true] %s20_s12  ;;  %s44_s14 = int_to_ptr.vmem [resolvable:$true] %s43_s14 }
  0x15   :  { %s780_s17 = scalar_lea.hbm %s981_s0, 16 }
  0x16   :  { %p781_p8 = scmp.ne.s32.totalorder %s981_s0, %s780_s17  ;;  %p784_p9 = scmp.lt.u32.totalorder %s780_s17, %s981_s0 }
  0x18   :  { %p786_p10 = pnand %p784_p9, %p781_p8 }
  0x1a   :  { %789 = shalt.err (!%p786_p10)
}
  0x1b   :  { %s790_s2 = scalar_lea.vmem %s21_s12, 16  ;;  %s794_s22 = scalar_lea.vmem %s21_s12, 32 }
  0x1c   :  { %p791_p11 = scmp.ne.s32.totalorder %s21_s12, %s790_s2  ;;  %p795_p12 = scmp.lt.s32.totalorder %s21_s12, %s21_s12 }
  0x1d   :  { %p796_p13 = scmp.lt.s32.totalorder %s794_s22, %s790_s2 }
  0x1f   :  { %p797_p0 = por %p796_p13, %p795_p12 }
  0x21   :  { %p798_p1 = pnand %p797_p0, %p791_p11 }
  0x23   :  { %801 = shalt.err (!%p798_p1)
}
  0x24   :  { %23 = dma.hbm_to_vmem [thread:$0]  %s981_s0, 16, %s21_s12, [#allocation3]  }
  0x25   :  { %s802_s27 = scalar_lea.hbm %s984_s3, 6144 }
  0x26   :  { %p803_p2 = scmp.ne.s32.totalorder %s984_s3, %s802_s27  ;;  %p806_p3 = scmp.lt.u32.totalorder %s802_s27, %s984_s3 }
  0x28   :  { %p808_p4 = pnand %p806_p3, %p803_p2 }
  0x2a   :  { %811 = shalt.err (!%p808_p4)
}
  0x2b   :  { %s812_s10 = scalar_lea.vmem %s44_s14, 6144  ;;  %p817_p6 = scmp.lt.s32.totalorder %s44_s14, %s44_s14 }
  0x2c   :  { %p813_p5 = scmp.ne.s32.totalorder %s44_s14, %s812_s10  ;;  %p818_p7 = scmp.lt.s32.totalorder %s812_s10, %s812_s10 }
  0x2e   :  { %p819_p8 = por %p818_p7, %p817_p6 }
  0x30   :  { %p820_p9 = pnand %p819_p8, %p813_p5 }
  0x32   :  { %823 = shalt.err (!%p820_p9)
}
  0x33   :  { %49 = dma.hbm_to_vmem [thread:$0]  %s984_s3, 6144, %s44_s14, [#allocation6], %s853_s7, %s853_s7, %s854_s8  }
  0x34   :  { %846 = dma.done.wait [#allocation3], 16  }
  0x35   :  { %847 = vsyncadd [#allocation3], 4294967280 }
  0x36   :  { %848 = dma.done.wait [#allocation6], 12288  }
  0x37   :  { %849 = vsyncadd [#allocation6], 4294955008  ;;  %v857_v0 = vmov 0.0|0.0   ;;  %v858_v1 = vmov 0.0   ;;  %vm859_vm0 = vmmov 0   ;;  %v64_v2 = vld [vmem:[#allocation5 + $0x8] sm:$0xff] }
  0x38   :  { %653 = vmatprep.subr.bf16.mxu1 %v857_v0  ;;  %243 = vmatprep.mubr.f32.mxu0 %v858_v1  ;;  %v67_v3 = vld [vmem:[#allocation5 + $0x20] sm:$0xff]  ;;  %v66_v6 = vld [vmem:[#allocation5 + $0x18] sm:$0xff]  ;;  %v73_v8 = vld [vmem:[#allocation5 + $0x50] sm:$0xff] }
  0x39   :  { %583 = vmatprep.mubr.msk.f32.mxu1 %vm859_vm0, %v858_v1  ;;  %v63_v4 = vld [vmem:[#allocation5] sm:$0xff]  ;;  %v621_v5 = vpack.c.bf16 %v67_v3, %v64_v2  ;;  %v70_v7 = vld [vmem:[#allocation5 + $0x38] sm:$0xff]  ;;  %v69_v11 = vld [vmem:[#allocation5 + $0x30] sm:$0xff] }
  0x3a   :  { %v623_v9 = vpack.c.bf16 %v66_v6, %v63_v4  ;;  %v625_v10 = vpack.c.bf16 %v73_v8, %v70_v7  ;;  %v72_v12 = vld [vmem:[#allocation5 + $0x48] sm:$0xff]  ;;  %v79_v14 = vld [vmem:[#allocation5 + $0x80] sm:$0xff]  ;;  %v78_v18 = vld [vmem:[#allocation5 + $0x78] sm:$0xff] }
  0x3b   :  { %v76_v13 = vld [vmem:[#allocation5 + $0x68] sm:$0xff]  ;;  %622 = vmatprep.subr.bf16.mxu0 %v621_v5  ;;  %v627_v15 = vpack.c.bf16 %v72_v12, %v69_v11  ;;  %v75_v17 = vld [vmem:[#allocation5 + $0x60] sm:$0xff]  ;;  %v82_v19 = vld [vmem:[#allocation5 + $0x98] sm:$0xff] }
  0x3c   :  { %624 = vmatpush1.bf16.msra.mxu0 %v623_v9  ;;  %v629_v16 = vpack.c.bf16 %v79_v14, %v76_v13  ;;  %v85_v20 = vld [vmem:[#allocation5 + $0xb0] sm:$0xff]  ;;  %v631_v21 = vpack.c.bf16 %v78_v18, %v75_v17  ;;  %v84_v24 = vld [vmem:[#allocation5 + $0xa8] sm:$0xff]  ;;  %v91_v28 = vld [vmem:[#allocation5 + $0xe0] sm:$0xff] }
  0x3d   :  { %626 = vmatprep.subr.bf16.mxu0 %v625_v10  ;;  %v81_v22 = vld [vmem:[#allocation5 + $0x90] sm:$0xff]  ;;  %v633_v23 = vpack.c.bf16 %v85_v20, %v82_v19  ;;  %v68_v26 = vld [vmem:[#allocation5 + $0x28] sm:$0xff]  ;;  %v71_v30 = vld [vmem:[#allocation5 + $0x40] sm:$0xff] }
  0x3e   :  { %v65_v25 = vld [vmem:[#allocation5 + $0x10] sm:$0xff]  ;;  %v88_v27 = vld [vmem:[#allocation5 + $0xc8] sm:$0xff]  ;;  %v74_v31 = vld [vmem:[#allocation5 + $0x58] sm:$0xff]  ;;  %v635_v32 = vpack.c.bf16 %v84_v24, %v81_v22 }
  0x3f   :  { %v654_v29 = vpack.c.bf16 %v68_v26, %v65_v25  ;;  %v657_v33 = vpack.c.bf16 %v74_v31, %v71_v30  ;;  %v637_v34 = vpack.c.bf16 %v91_v28, %v88_v27  ;;  %v87_v35 = vld [vmem:[#allocation5 + $0xc0] sm:$0xff]  ;;  %v90_v36 = vld [vmem:[#allocation5 + $0xd8] sm:$0xff]  ;;  %v77_v37 = vld [vmem:[#allocation5 + $0x70] sm:$0xff] }
  0x40   :  { %628 = vmatpush1.bf16.msra.mxu0 %v627_v15  ;;  %v94_v38 = vld [vmem:[#allocation5 + $0xf8] sm:$0xff]  ;;  %v97_v39 = vld [vmem:[#allocation5 + $0x110] sm:$0xff]  ;;  %v80_v40 = vld [vmem:[#allocation5 + $0x88] sm:$0xff]  ;;  %v639_v41 = vpack.c.bf16 %v90_v36, %v87_v35 }
  0x41   :  { %630 = vmatprep.subr.bf16.mxu0 %v629_v16  ;;  %655 = vmatpush3.bf16.msra.mxu1 %v654_v29  ;;  %v93_v42 = vld [vmem:[#allocation5 + $0xf0] sm:$0xff]  ;;  %v660_v43 = vpack.c.bf16 %v80_v40, %v77_v37  ;;  %v641_v44 = vpack.c.bf16 %v97_v39, %v94_v38  ;;  %v96_v45 = vld [vmem:[#allocation5 + $0x108] sm:$0xff]  ;;  %v83_v46 = vld [vmem:[#allocation5 + $0xa0] sm:$0xff] }
  0x42   :  { %656 = vmatprep.subr.bf16.mxu1 %v857_v0  ;;  %v86_v47 = vld [vmem:[#allocation5 + $0xb8] sm:$0xff]  ;;  %v100_v48 = vld [vmem:[#allocation5 + $0x128] sm:$0xff]  ;;  %v103_v49 = vld [vmem:[#allocation5 + $0x140] sm:$0xff]  ;;  %v643_v50 = vpack.c.bf16 %v96_v45, %v93_v42 }
  0x43   :  { %v99_v51 = vld [vmem:[#allocation5 + $0x120] sm:$0xff]  ;;  %v663_v52 = vpack.c.bf16 %v86_v47, %v83_v46  ;;  %v645_v53 = vpack.c.bf16 %v103_v49, %v100_v48  ;;  %v102_v54 = vld [vmem:[#allocation5 + $0x138] sm:$0xff]  ;;  %v89_v55 = vld [vmem:[#allocation5 + $0xd0] sm:$0xff] }
  0x44   :  { %632 = vmatpush1.bf16.msra.mxu0 %v631_v21  ;;  %v92_v56 = vld [vmem:[#allocation5 + $0xe8] sm:$0xff]  ;;  %v106_v57 = vld [vmem:[#allocation5 + $0x158] sm:$0xff]  ;;  %v109_v58 = vld [vmem:[#allocation5 + $0x170] sm:$0xff]  ;;  %v647_v59 = vpack.c.bf16 %v102_v54, %v99_v51 }
  0x45   :  { %634 = vmatprep.subr.bf16.mxu0 %v633_v23  ;;  %658 = vmatpush3.bf16.msra.mxu1 %v657_v33  ;;  %v105_v60 = vld [vmem:[#allocation5 + $0x150] sm:$0xff]  ;;  %v666_v61 = vpack.c.bf16 %v92_v56, %v89_v55  ;;  %v649_v62 = vpack.c.bf16 %v109_v58, %v106_v57  ;;  %v108_v63 = vld [vmem:[#allocation5 + $0x168] sm:$0xff]  ;;  %v95_v2 = vld [vmem:[#allocation5 + $0x100] sm:$0xff] }
  0x46   :  { %659 = vmatprep.subr.bf16.mxu1 %v857_v0  ;;  %v98_v3 = vld [vmem:[#allocation5 + $0x118] sm:$0xff]  ;;  %v112_v4 = vld [vmem:[#allocation7 + $0x8] sm:$0xff]  ;;  %v115_v5 = vld [vmem:[#allocation7 + $0x20] sm:$0xff]  ;;  %v651_v6 = vpack.c.bf16 %v108_v63, %v105_v60 }
  0x47   :  { %v111_v7 = vld [vmem:[#allocation7] sm:$0xff]  ;;  %v669_v8 = vpack.c.bf16 %v98_v3, %v95_v2  ;;  %v677_v9 = vpack.c.bf16 %v115_v5, %v112_v4  ;;  %v114_v10 = vld [vmem:[#allocation7 + $0x18] sm:$0xff]  ;;  %v101_v11 = vld [vmem:[#allocation5 + $0x130] sm:$0xff] }
  0x48   :  { %636 = vmatpush1.bf16.msra.mxu0 %v635_v32  ;;  %v104_v12 = vld [vmem:[#allocation5 + $0x148] sm:$0xff]  ;;  %v118_v13 = vld [vmem:[#allocation7 + $0x38] sm:$0xff]  ;;  %v121_v14 = vld [vmem:[#allocation7 + $0x50] sm:$0xff]  ;;  %v679_v16 = vpack.c.bf16 %v114_v10, %v111_v7 }
  0x49   :  { %638 = vmatprep.subr.bf16.mxu0 %v637_v34  ;;  %661 = vmatpush3.bf16.msra.mxu1 %v660_v43  ;;  %v162_v15 = vld [vmem:[#allocation2] sm:$0x1]  ;;  %v117_v17 = vld [vmem:[#allocation7 + $0x30] sm:$0xff]  ;;  %v672_v18 = vpack.c.bf16 %v104_v12, %v101_v11  ;;  %v681_v19 = vpack.c.bf16 %v121_v14, %v118_v13  ;;  %v120_v20 = vld [vmem:[#allocation7 + $0x48] sm:$0xff] }
  0x4a   :  { %662 = vmatprep.subr.bf16.mxu1 %v857_v0  ;;  %v107_v21 = vld [vmem:[#allocation5 + $0x160] sm:$0xff]  ;;  %v110_v22 = vld [vmem:[#allocation5 + $0x178] sm:$0xff]  ;;  %v124_v23 = vld [vmem:[#allocation7 + $0x68] sm:$0xff]  ;;  %v683_v25 = vpack.c.bf16 %v120_v20, %v117_v17 }
  0x4b   :  { %v127_v24 = vld [vmem:[#allocation7 + $0x80] sm:$0xff]  ;;  %v675_v27 = vpack.c.bf16 %v110_v22, %v107_v21  ;;  %v126_v29 = vld [vmem:[#allocation7 + $0x78] sm:$0xff]  ;;  %v113_v30 = vld [vmem:[#allocation7 + $0x10] sm:$0xff] }
  0x4c   :  { %640 = vmatpush1.bf16.msra.mxu0 %v639_v41  ;;  %v123_v26 = vld [vmem:[#allocation7 + $0x60] sm:$0xff]  ;;  %v685_v28 = vpack.c.bf16 %v127_v24, %v124_v23  ;;  %v116_v31 = vld [vmem:[#allocation7 + $0x28] sm:$0xff]  ;;  %v130_v32 = vld [vmem:[#allocation7 + $0x98] sm:$0xff] }
  0x4d   :  { %642 = vmatprep.subr.bf16.mxu0 %v641_v44  ;;  %664 = vmatpush3.bf16.msra.mxu1 %v663_v52  ;;  %v133_v33 = vld [vmem:[#allocation7 + $0xb0] sm:$0xff]  ;;  %v687_v34 = vpack.c.bf16 %v126_v29, %v123_v26  ;;  %v710_v36 = vpack.c.bf16 %v116_v31, %v113_v30  ;;  %v132_v38 = vld [vmem:[#allocation7 + $0xa8] sm:$0xff]  ;;  %v119_v39 = vld [vmem:[#allocation7 + $0x40] sm:$0xff] }
  0x4e   :  { %665 = vmatprep.subr.bf16.mxu1 %v857_v0  ;;  %v129_v35 = vld [vmem:[#allocation7 + $0x90] sm:$0xff]  ;;  %v689_v37 = vpack.c.bf16 %v133_v33, %v130_v32  ;;  %v122_v40 = vld [vmem:[#allocation7 + $0x58] sm:$0xff]  ;;  %v136_v41 = vld [vmem:[#allocation7 + $0xc8] sm:$0xff] }
  0x4f   :  { %v139_v42 = vld [vmem:[#allocation7 + $0xe0] sm:$0xff]  ;;  %v691_v43 = vpack.c.bf16 %v132_v38, %v129_v35  ;;  %v713_v45 = vpack.c.bf16 %v122_v40, %v119_v39  ;;  %v138_v47 = vld [vmem:[#allocation7 + $0xd8] sm:$0xff]  ;;  %v125_v48 = vld [vmem:[#allocation7 + $0x70] sm:$0xff] }
  0x50   :  { %644 = vmatpush1.bf16.msra.mxu0 %v643_v50  ;;  %v135_v44 = vld [vmem:[#allocation7 + $0xc0] sm:$0xff]  ;;  %v693_v46 = vpack.c.bf16 %v139_v42, %v136_v41  ;;  %v128_v49 = vld [vmem:[#allocation7 + $0x88] sm:$0xff]  ;;  %v142_v50 = vld [vmem:[#allocation7 + $0xf8] sm:$0xff] }
  0x51   :  { %646 = vmatprep.subr.bf16.mxu0 %v645_v53  ;;  %667 = vmatpush3.bf16.msra.mxu1 %v666_v61  ;;  %v145_v51 = vld [vmem:[#allocation7 + $0x110] sm:$0xff]  ;;  %v695_v52 = vpack.c.bf16 %v138_v47, %v135_v44  ;;  %v716_v54 = vpack.c.bf16 %v128_v49, %v125_v48  ;;  %v144_v56 = vld [vmem:[#allocation7 + $0x108] sm:$0xff]  ;;  %v131_v57 = vld [vmem:[#allocation7 + $0xa0] sm:$0xff] }
  0x52   :  { %668 = vmatprep.subr.bf16.mxu1 %v857_v0  ;;  %v141_v53 = vld [vmem:[#allocation7 + $0xf0] sm:$0xff]  ;;  %v697_v55 = vpack.c.bf16 %v145_v51, %v142_v50  ;;  %v134_v58 = vld [vmem:[#allocation7 + $0xb8] sm:$0xff]  ;;  %v151_v60 = vld [vmem:[#allocation7 + $0x140] sm:$0xff] }
  0x53   :  { %v699_v61 = vpack.c.bf16 %v144_v56, %v141_v53  ;;  %v719_v63 = vpack.c.bf16 %v134_v58, %v131_v57  ;;  %v150_v2 = vld [vmem:[#allocation7 + $0x138] sm:$0xff]  ;;  %v137_v3 = vld [vmem:[#allocation7 + $0xd0] sm:$0xff]  ;;  %v140_v4 = vld [vmem:[#allocation7 + $0xe8] sm:$0xff] }
  0x54   :  { %648 = vmatpush1.bf16.msra.mxu0 %v647_v59  ;;  %v148_v59 = vld [vmem:[#allocation7 + $0x128] sm:$0xff]  ;;  %v154_v5 = vld [vmem:[#allocation7 + $0x158] sm:$0xff]  ;;  %v143_v12 = vld [vmem:[#allocation7 + $0x100] sm:$0xff] }
  0x55   :  { %650 = vmatprep.subr.bf16.mxu0 %v649_v62  ;;  %670 = vmatpush3.bf16.msra.mxu1 %v669_v8  ;;  %v147_v62 = vld [vmem:[#allocation7 + $0x120] sm:$0xff]  ;;  %v153_v8 = vld [vmem:[#allocation7 + $0x150] sm:$0xff]  ;;  %v156_v11 = vld [vmem:[#allocation7 + $0x168] sm:$0xff] }
  0x56   :  { %671 = vmatprep.subr.bf16.mxu1 %v857_v0  ;;  %v703_v7 = vpack.c.bf16 %v150_v2, %v147_v62  ;;  %v146_v13 = vld [vmem:[#allocation7 + $0x118] sm:$0xff]  ;;  %v707_v14 = vpack.c.bf16 %v156_v11, %v153_v8  ;;  %v152_v17 = vld [vmem:[#allocation7 + $0x148] sm:$0xff]  ;;  %v155_v20 = vld [vmem:[#allocation7 + $0x160] sm:$0xff] }
  0x57   :  { %v158_v21 = vld [vmem:[#allocation7 + $0x178] sm:$0xff]  ;;  %v159_v29 = vld [vmem:[%s985_s4] sm:$0x7]  ;;  %s860_s4 = smov [#allocation8]  }
  0x58   :  { %652 = vmatpush1.bf16.msra.mxu0 %v651_v6  ;;  %v157_v6 = vld [vmem:[#allocation7 + $0x170] sm:$0xff]  ;;  %v731_v22 = vpack.c.bf16 %v158_v21, %v155_v20 }
  0x59   :  { %678 = vmatprep.subr.bf16.mxu0 %v677_v9  ;;  %673 = vmatpush3.bf16.msra.mxu1 %v672_v18  ;;  %v722_v9 = vpack.c.bf16 %v140_v4, %v137_v3  ;;  %v705_v10 = vpack.c.bf16 %v157_v6, %v154_v5  ;;  %v161_v18 = vld [vmem:[%s982_s1] sm:$0x1] }
  0x5a   :  { %674 = vmatprep.subr.bf16.mxu1 %v857_v0 }
  0x5b   :  { %244 = vmatmul.mubr.f32.vlgmr.msra.gmra.mrb[0].mxu0 %v162_v15 }
  0x5c   :  { %680 = vmatpush1.bf16.msra.mxu0 %v679_v16  ;;  %400 = vmatprep.mubr.f32.mxu0 %v858_v1  ;;  %v149_v16 = vld [vmem:[#allocation7 + $0x130] sm:$0xff] }
  0x5d   :  { %682 = vmatprep.subr.bf16.mxu0 %v681_v19  ;;  %676 = vmatpush3.bf16.msra.mxu1 %v675_v27  ;;  %v728_v19 = vpack.c.bf16 %v152_v17, %v149_v16 }
  0x5e   :  { %709 = vmatprep.subr.bf16.mxu1 %v857_v0 }
  0x60   :  { %684 = vmatpush1.bf16.msra.mxu0 %v683_v25  ;;  %584 = vmatmul.mubr.f32.vlgmr.msra.gmra.mrb[0].mxu1 %v162_v15  ;;  %v725_v15 = vpack.c.bf16 %v146_v13, %v143_v12  ;;  %v164_v25 = vlaneseq }
  0x61   :  { %686 = vmatprep.subr.bf16.mxu0 %v685_v28  ;;  %711 = vmatpush3.bf16.msra.mxu1 %v710_v36  ;;  %v160_v28 = vld [vmem:[%s986_s5] sm:$0x7]  ;;  %s505_s5 = sshll.u32 %s860_s4, 4  ;;  %s506_s5 = int_to_ptr.vmem [resolvable:$true] %s505_s5 }
  0x62   :  { %712 = vmatprep.subr.bf16.mxu1 %v857_v0  ;;  %618 = vmatprep.mubr.msk.f32.mxu1 %vm859_vm0, %v858_v1  ;;  %v701_v1 = vpack.c.bf16 %v151_v60, %v148_v59  ;;  %v165_v26 = vshrl.u32 %v164_v25, 7  ;;  %s824_s14 = scalar_lea.vmem %s506_s5, 16  ;;  %s828_s15 = scalar_lea.vmem %s506_s5, 32 }
  0x63   :  { %p825_p10 = scmp.ne.s32.totalorder %s506_s5, %s824_s14  ;;  %p829_p11 = scmp.lt.s32.totalorder %s506_s5, %s506_s5 }
  0x64   :  { %688 = vmatpush1.bf16.msra.mxu0 %v687_v34  ;;  %v166_v27 = vsub.s32 0, %v165_v26  ;;  %v170_v30 = vsub.s32 1, %v165_v26  ;;  %p830_p12 = scmp.lt.s32.totalorder %s828_s15, %s824_s14 }
  0x65   :  { %690 = vmatprep.subr.bf16.mxu0 %v689_v37  ;;  %714 = vmatpush3.bf16.msra.mxu1 %v713_v45 }
  0x66   :  { %715 = vmatprep.subr.bf16.mxu1 %v857_v0  ;;  %v167_v31 = vrot.slane %v159_v29, %v166_v27  ;;  %v324_v32 = vrot.slane %v160_v28, %v166_v27  ;;  %v171_v33 = vrot.slane %v159_v29, %v170_v30  ;;  %p831_p13 = por %p830_p12, %p829_p11 }
  0x68   :  { %692 = vmatpush1.bf16.msra.mxu0 %v691_v43  ;;  %v733_v34 = vadd.f32 %v324_v32, %v167_v31  ;;  %p832_p0 = pnand %p831_p13, %p825_p10 }
  0x69   :  { %694 = vmatprep.subr.bf16.mxu0 %v693_v46  ;;  %717 = vmatpush3.bf16.msra.mxu1 %v716_v54  ;;  %v174_v46 = vsub.s32 2, %v165_v26 }
  0x6a   :  { %718 = vmatprep.subr.bf16.mxu1 %v857_v0 }
  0x6b   :  { %v332_v47 = vrot.slane %v160_v28, %v174_v46  ;;  %v175_v49 = vrot.slane %v159_v29, %v174_v46 }
  0x6c   :  { %696 = vmatpush1.bf16.msra.mxu0 %v695_v52 }
  0x6d   :  { %698 = vmatprep.subr.bf16.mxu0 %v697_v55  ;;  %720 = vmatpush3.bf16.msra.mxu1 %v719_v63 }
  0x6e   :  { %721 = vmatprep.subr.bf16.mxu1 %v857_v0 }
  0x70   :  { %700 = vmatpush1.bf16.msra.mxu0 %v699_v61 }
  0x71   :  { %702 = vmatprep.subr.bf16.mxu0 %v701_v1  ;;  %723 = vmatpush3.bf16.msra.mxu1 %v722_v9 }
  0x72   :  { %724 = vmatprep.subr.bf16.mxu1 %v857_v0 }
  0x74   :  { %704 = vmatpush1.bf16.msra.mxu0 %v703_v7 }
  0x75   :  { %706 = vmatprep.subr.bf16.mxu0 %v705_v10  ;;  %726 = vmatpush3.bf16.msra.mxu1 %v725_v15 }
  0x76   :  { %727 = vmatprep.subr.bf16.mxu1 %v857_v0 }
  0x78   :  { %708 = vmatpush1.bf16.msra.mxu0 %v707_v14 }
  0x79   :  { %729 = vmatpush3.bf16.msra.mxu1 %v728_v19 }
  0x7a   :  { %730 = vmatprep.subr.bf16.mxu1 %v857_v0  ;;  %v328_v0 = vrot.slane %v160_v28, %v170_v30 }
  0x7b   :  { %401 = vmatmul.mubr.f32.vlgmr.msra.gmra.mrb[0].mxu0 %v161_v18 }
  0x7c   :  { %v735_v36 = vadd.f32 %v328_v0, %v171_v33 }
  0x7d   :  { %732 = vmatpush3.bf16.msra.mxu1 %v731_v22 }
  0x80   :  { %619 = vmatmul.mubr.f32.vlgmr.msra.gmra.mrb[2].mxu1 %v161_v18 }
 0x133   :  { %v316_v23 = vpop.f32.mrb[0].mxu1 }
 0x134   :  { %v585_v24 = vpop.f32.mrb[1].mxu1  ;;  %v317_v53 = vadd.f32 %v316_v23, %v175_v49 }
 0x14e   :  { %v402_v35 = vpop.f32.mrb[0].mxu0 }
 0x14f   :  { %v734_v37 = vadd.f32 %v733_v34, %v402_v35  ;;  %v404_v38 = vpop.f32.mrb[1].mxu0 }
 0x150   :  { %v736_v40 = vadd.f32 %v735_v36, %v404_v38 }
 0x151   :  { %v515_v39 = vmul.f32 -1.442695, %v734_v37 }
 0x152   :  { %v516_v41 = vmul.f32 -1.442695, %v736_v40 }
 0x153   :  { %748 = vpow2.f32 %v515_v39  ;;  %v473_v42 = vpop.f32.mrb[2].mxu1 }
 0x154   :  { %v620_v43 = vpop.f32.mrb[3].mxu1  ;;  %750 = vpow2.f32 %v516_v41  ;;  %v474_v51 = vadd.f32 %v473_v42, %v332_v47 }
 0x15d   :  { %v749_v44 = vpop.eup %748 }
 0x15e   :  { %v481_v45 = vadd.f32 1.0, %v749_v44  ;;  %v751_v48 = vpop.eup %750 }
 0x15f   :  { %v488_v50 = vadd.f32 1.0, %v751_v48 }
 0x160   :  { %752 = vrcp.f32 %v481_v45 }
 0x161   :  { %754 = vrcp.f32 %v488_v50 }
 0x16a   :  { %v753_v52 = vpop.eup %752 }
 0x16b   :  { %v491_v54 = vmul.f32 %v753_v52, %v474_v51  ;;  %v755_v56 = vpop.eup %754 }
 0x16c   :  { %v494_v57 = vsub.f32 1.0, %v755_v56  ;;  %v496_v60 = vmul.f32 %v755_v56, %v161_v18 }
 0x16d   :  { %v492_v55 = vadd.f32 %v491_v54, %v317_v53 }
 0x16f   :  { %756 = vtanh.f32 %v492_v55 }
 0x179   :  { %v757_v58 = vpop.eup %756 }
 0x17a   :  { %v495_v59 = vmul.f32 %v757_v58, %v494_v57 }
 0x17c   :  { %v497_v61 = vadd.f32 %v496_v60, %v495_v59 }
 0x17e   :  { %498 = vst [vmem:[#allocation8] sm:$0x1] %v497_v61 }
 0x17f   :  { %835 = shalt.err (!%p832_p0)
}
 0x180   :  { %s836_s18 = scalar_lea.hbm %s987_s6, 16 }
 0x181   :  { %p837_p1 = scmp.ne.s32.totalorder %s987_s6, %s836_s18  ;;  %p840_p2 = scmp.lt.u32.totalorder %s836_s18, %s987_s6 }
 0x183   :  { %p842_p3 = pnand %p840_p2, %p837_p1 }
 0x185   :  { %845 = shalt.err (!%p842_p3)
}
 0x186   :  { %508 = dma.vmem_to_hbm [thread:$0]  %s506_s5, 16, %s987_s6, [#allocation4]  }
 0x187   :  { %850 = dma.done.wait [#allocation4], 16  }
 0x188   :  { %851 = vsyncadd [#allocation4], 4294967280 }
 0x189   :  { %512 = vsyncpa [#allocation3], 1 }
 0x18a   :  { %513 = vsyncpa [#allocation6], 1 }
 0x18b   :  { %514 = vsyncpa [#allocation4], 1 }

</bundles_post_ra>
